<compile_context>
chip_gen: v6e
topology: v6e:2x2x1
jax: 0.10.0
libtpu: 0.0.40
codegen_flags: <defaults>
</compile_context>

<pallas_src>
import functools

import jax
import jax.numpy as jnp
from jax.experimental import pallas as pl
from jax.experimental.pallas import tpu as pltpu


def _round_up(x: int, m: int) -> int:
    return (x + m - 1) // m * m


def _fused_mlp_kernel(x_ref, w_ref, b_ref, o_ref, *, num_linear: int, compute_dtype):
    # x: (Bp, P) f32, w: (L, P, P) f32, b: (L, 1, P) f32 -> o: (Bp, P) f32
    h = x_ref[...]
    for l in range(num_linear):  # static unrolled loop over layers
        lhs = h.astype(compute_dtype)
        rhs = w_ref[l].astype(compute_dtype)
        y = jnp.dot(lhs, rhs, preferred_element_type=jnp.float32)
        y = y + b_ref[l]  # (1, P) broadcast over rows
        if l != num_linear - 1:
            y = jnp.maximum(y, 0.0)  # ReLU (Dropout = identity in eval mode)
        h = y
    o_ref[...] = h.astype(o_ref.dtype)


def mlp_forward_pallas(x, params, *, compute_dtype=jnp.float32):
    """Full MLP forward in one fused Pallas call.

    params: list of (w, b) with w stored as [in_features, out_features]
            (so the kernel computes y = x @ W + b, equivalent to torch's
            x @ W_t.T + b).
    compute_dtype: jnp.float32 (exact, default) or jnp.bfloat16 (faster MXU
            path on v6e/v7x, still fp32-accumulated).
    """
    # grad_rev forward: cast to float32 (reversal affects backward only)
    x = x.astype(jnp.float32)
    B, Din = x.shape
    L = len(params)

    all_dims = [Din] + [w.shape[1] for (w, _) in params]
    P = _round_up(max(all_dims), 128)  # lane-dense common feature width
    Bp = _round_up(B, 8)               # sublane-aligned batch

    # Zero-pad & stack weights/biases -> (L, P, P) / (L, 1, P).
    # Zero padding keeps the math exact (padded rows/cols contribute 0, ReLU(0)=0).
    w_stack = jnp.zeros((L, P, P), jnp.float32)
    b_stack = jnp.zeros((L, 1, P), jnp.float32)
    for i, (w, b) in enumerate(params):
        w_stack = w_stack.at[i, : w.shape[0], : w.shape[1]].set(w.astype(jnp.float32))
        b_stack = b_stack.at[i, 0, : b.shape[0]].set(b.astype(jnp.float32))

    x_pad = jnp.zeros((Bp, P), jnp.float32).at[:B, :Din].set(x)

    kernel = functools.partial(
        _fused_mlp_kernel, num_linear=L, compute_dtype=compute_dtype
    )
    out_pad = pl.pallas_call(
        kernel,
        out_shape=jax.ShapeDtypeStruct((Bp, P), jnp.float32),
        grid_spec=pl.GridSpec(
            grid=(1,),
            in_specs=[
                pl.BlockSpec((Bp, P), lambda i: (0, 0)),
                pl.BlockSpec((L, P, P), lambda i: (0, 0, 0)),
                pl.BlockSpec((L, 1, P), lambda i: (0, 0, 0)),
            ],
            out_specs=pl.BlockSpec((Bp, P), lambda i: (0, 0)),
        ),
        compiler_params=pltpu.CompilerParams(dimension_semantics=("arbitrary",)),
    )(x_pad, w_stack, b_stack)

    Dout = params[-1][0].shape[1]
    return out_pad[:B, :Dout]


def init_mlp_params(key, input_dim, output_dim, num_layers, hidden_dim):
    """Deterministic init mimicking torch.nn.Linear default (uniform +/- 1/sqrt(fan_in)).

    Weights stored as [in_features, out_features]."""
    dims = [input_dim] + [hidden_dim] * num_layers + [output_dim]
    params = []
    for i in range(len(dims) - 1):
        fan_in, fan_out = dims[i], dims[i + 1]
        key, kw, kb = jax.random.split(key, 3)
        bound = 1.0 / jnp.sqrt(jnp.float32(fan_in))
        w = jax.random.uniform(kw, (fan_in, fan_out), jnp.float32, -bound, bound)
        b = jax.random.uniform(kb, (fan_out,), jnp.float32, -bound, bound)
        params.append((w, b))
    return params


if __name__ == "__main__":
    input_dim, output_dim, num_layers, hidden_dim = 32, 16, 2, 32
    batch = 8

    key = jax.random.PRNGKey(0)
    key, kx = jax.random.split(key)
    x = jax.random.normal(kx, (batch, input_dim), dtype=jnp.float32)

    params = init_mlp_params(key, input_dim, output_dim, num_layers, hidden_dim)

    out = mlp_forward_pallas(x, params)
    out = jax.block_until_ready(out)

    # sanity: compare against a plain-JAX reference of the same forward
    ref = x.astype(jnp.float32)
    for i, (w, b) in enumerate(params):
        ref = ref @ w + b
        if i != len(params) - 1:
            ref = jnp.maximum(ref, 0.0)
    assert out.shape == (batch, output_dim)
    assert jnp.allclose(out, ref, atol=1e-5, rtol=1e-5)

    print("KERNEL_OK")
</pallas_src>

<mosaic_0001>
module attributes {stable_mosaic.version = 11 : i64} {
  func.func @_fused_mlp_kernel(%arg0: i32, %arg1: memref<8x128xf32, #tpu.memory_space<vmem>>, %arg2: memref<3x128x128xf32, #tpu.memory_space<vmem>>, %arg3: memref<3x1x128xf32, #tpu.memory_space<vmem>>, %arg4: memref<8x128xf32, #tpu.memory_space<vmem>>) attributes {dimension_semantics = [#tpu.dimension_semantics<arbitrary>], iteration_bounds = array<i64: 1>, scalar_prefetch = 0 : i64, scratch_operands = 0 : i64, tpu.core_type = #tpu.core_type<tc>, window_params = [{pipeline_mode = #tpu.pipeline_mode<synchronous>, transform_indices = @transform_0, window_bounds = array<i64: 8, 128>}, {pipeline_mode = #tpu.pipeline_mode<synchronous>, transform_indices = @transform_1, window_bounds = array<i64: 3, 128, 128>}, {pipeline_mode = #tpu.pipeline_mode<synchronous>, transform_indices = @transform_2, window_bounds = array<i64: 3, 1, 128>}, {pipeline_mode = #tpu.pipeline_mode<synchronous>, transform_indices = @transform_3, window_bounds = array<i64: 8, 128>}]} {
    %c0 = arith.constant 0 : index
    %c0_0 = arith.constant 0 : index
    %0 = vector.load %arg1[%c0, %c0_0] : memref<8x128xf32, #tpu.memory_space<vmem>>, vector<8x128xf32>
    %c0_1 = arith.constant 0 : index
    %c0_2 = arith.constant 0 : index
    %c0_3 = arith.constant 0 : index
    %1 = vector.load %arg2[%c0_1, %c0_2, %c0_3] : memref<3x128x128xf32, #tpu.memory_space<vmem>>, vector<1x128x128xf32>
    %2 = vector.shape_cast %1 : vector<1x128x128xf32> to vector<128x128xf32>
    %cst = arith.constant dense<0.000000e+00> : vector<8x128xf32>
    %3 = tpu.matmul %0, %2, %cst {dimension_numbers = #tpu.dot_dimension_numbers<[1], [0], [0], [1], [0, 0, 1, 1], [], []>} : vector<8x128xf32>, vector<128x128xf32>, vector<8x128xf32> -> vector<8x128xf32>
    %c0_4 = arith.constant 0 : index
    %c0_5 = arith.constant 0 : index
    %c0_6 = arith.constant 0 : index
    %4 = vector.load %arg3[%c0_4, %c0_5, %c0_6] : memref<3x1x128xf32, #tpu.memory_space<vmem>>, vector<1x1x128xf32>
    %5 = vector.shape_cast %4 : vector<1x1x128xf32> to vector<1x128xf32>
    %6 = vector.broadcast %5 : vector<1x128xf32> to vector<8x128xf32>
    %7 = arith.addf %3, %6 : vector<8x128xf32>
    %cst_7 = arith.constant 0.000000e+00 : f32
    %8 = vector.broadcast %cst_7 : f32 to vector<8x128xf32>
    %9 = arith.maximumf %7, %8 : vector<8x128xf32>
    %c1 = arith.constant 1 : index
    %c0_8 = arith.constant 0 : index
    %c0_9 = arith.constant 0 : index
    %10 = vector.load %arg2[%c1, %c0_8, %c0_9] : memref<3x128x128xf32, #tpu.memory_space<vmem>>, vector<1x128x128xf32>
    %11 = vector.shape_cast %10 : vector<1x128x128xf32> to vector<128x128xf32>
    %cst_10 = arith.constant dense<0.000000e+00> : vector<8x128xf32>
    %12 = tpu.matmul %9, %11, %cst_10 {dimension_numbers = #tpu.dot_dimension_numbers<[1], [0], [0], [1], [0, 0, 1, 1], [], []>} : vector<8x128xf32>, vector<128x128xf32>, vector<8x128xf32> -> vector<8x128xf32>
    %c1_11 = arith.constant 1 : index
    %c0_12 = arith.constant 0 : index
    %c0_13 = arith.constant 0 : index
    %13 = vector.load %arg3[%c1_11, %c0_12, %c0_13] : memref<3x1x128xf32, #tpu.memory_space<vmem>>, vector<1x1x128xf32>
    %14 = vector.shape_cast %13 : vector<1x1x128xf32> to vector<1x128xf32>
    %15 = vector.broadcast %14 : vector<1x128xf32> to vector<8x128xf32>
    %16 = arith.addf %12, %15 : vector<8x128xf32>
    %cst_14 = arith.constant 0.000000e+00 : f32
    %17 = vector.broadcast %cst_14 : f32 to vector<8x128xf32>
    %18 = arith.maximumf %16, %17 : vector<8x128xf32>
    %c2 = arith.constant 2 : index
    %c0_15 = arith.constant 0 : index
    %c0_16 = arith.constant 0 : index
    %19 = vector.load %arg2[%c2, %c0_15, %c0_16] : memref<3x128x128xf32, #tpu.memory_space<vmem>>, vector<1x128x128xf32>
    %20 = vector.shape_cast %19 : vector<1x128x128xf32> to vector<128x128xf32>
    %cst_17 = arith.constant dense<0.000000e+00> : vector<8x128xf32>
    %21 = tpu.matmul %18, %20, %cst_17 {dimension_numbers = #tpu.dot_dimension_numbers<[1], [0], [0], [1], [0, 0, 1, 1], [], []>} : vector<8x128xf32>, vector<128x128xf32>, vector<8x128xf32> -> vector<8x128xf32>
    %c2_18 = arith.constant 2 : index
    %c0_19 = arith.constant 0 : index
    %c0_20 = arith.constant 0 : index
    %22 = vector.load %arg3[%c2_18, %c0_19, %c0_20] : memref<3x1x128xf32, #tpu.memory_space<vmem>>, vector<1x1x128xf32>
    %23 = vector.shape_cast %22 : vector<1x1x128xf32> to vector<1x128xf32>
    %24 = vector.broadcast %23 : vector<1x128xf32> to vector<8x128xf32>
    %25 = arith.addf %21, %24 : vector<8x128xf32>
    %c0_21 = arith.constant 0 : index
    %c0_22 = arith.constant 0 : index
    %26 = vector.load %arg4[%c0_21, %c0_22] : memref<8x128xf32, #tpu.memory_space<vmem>>, vector<8x128xf32>
    tpu.vector_store %arg4[%c0_21, %c0_22], %25 {strides = array<i32>} : memref<8x128xf32, #tpu.memory_space<vmem>>, vector<8x128xf32>,
    return
  }
  func.func @transform_0(%arg0: i32) -> (i32, i32) {
    %c0_i32 = arith.constant 0 : i32
    %c0_i32_0 = arith.constant 0 : i32
    %c0_i32_1 = arith.constant 0 : i32
    return %c0_i32, %c0_i32_0 : i32, i32
  }
  func.func @transform_1(%arg0: i32) -> (i32, i32, i32) {
    %c0_i32 = arith.constant 0 : i32
    %c0_i32_0 = arith.constant 0 : i32
    %c0_i32_1 = arith.constant 0 : i32
    %c0_i32_2 = arith.constant 0 : i32
    return %c0_i32, %c0_i32_0, %c0_i32_1 : i32, i32, i32
  }
  func.func @transform_2(%arg0: i32) -> (i32, i32, i32) {
    %c0_i32 = arith.constant 0 : i32
    %c0_i32_0 = arith.constant 0 : i32
    %c0_i32_1 = arith.constant 0 : i32
    %c0_i32_2 = arith.constant 0 : i32
    return %c0_i32, %c0_i32_0, %c0_i32_1 : i32, i32, i32
  }
  func.func @transform_3(%arg0: i32) -> (i32, i32) {
    %c0_i32 = arith.constant 0 : i32
    %c0_i32_0 = arith.constant 0 : i32
    %c0_i32_1 = arith.constant 0 : i32
    return %c0_i32, %c0_i32_0 : i32, i32
  }
}

</mosaic_0001>

<bundles_post_ra>
// kernel: tpu_custom_call.1
= control target key start
LH: loop header
LB: loop body
LE: loop exit
PB: predicated region body
PF: predicated region fallthrough
CT: control target
= control target key end

     0   :  { %8 = vsyncpa [#allocation3], 0  ;;  %s677_s0 = inlined_call_operand.hbm [shape: f32[8,128], index: 0, kind: input, shape index: {}]   ;;  %s678_s1 = inlined_call_operand.hbm [shape: f32[3,128,128], index: 1, kind: input, shape index: {}]   ;;  %s679_s2 = inlined_call_operand.vmem [shape: f32[3,1,128], index: 2, kind: input, shape index: {}]   ;;  %s680_s3 = inlined_call_operand.hbm [shape: f32[8,128], index: 3, kind: output, shape index: {}]  }
   0x1   :  { %9 = vsyncpa [#allocation6], 0 }
   0x2   :  { %10 = vsyncpa [#allocation4], 0  ;;  %s578_s12 = smov [#allocation2]   ;;  %s579_s14 = smov [#allocation5]  }
   0x3   :  { %s17_s13 = sshll.u32 %s578_s12, 4  ;;  %s26_s15 = sshll.u32 %s579_s14, 4  ;;  %s18_s13 = int_to_ptr.vmem [resolvable:$true] %s17_s13  ;;  %s27_s15 = int_to_ptr.vmem [resolvable:$true] %s26_s15 }
   0x4   :  { %s520_s16 = scalar_lea.vmem %s18_s13, 128  ;;  %p525_p1 = scmp.lt.s32.totalorder %s18_s13, %s18_s13 }
   0x5   :  { %p521_p0 = scmp.ne.s32.totalorder %s18_s13, %s520_s16  ;;  %p526_p2 = scmp.lt.s32.totalorder %s520_s16, %s520_s16 }
   0x7   :  { %p527_p3 = por %p526_p2, %p525_p1 }
   0x9   :  { %p528_p4 = pnand %p527_p3, %p521_p0 }
   0xb   :  { %531 = shalt.err (!%p528_p4)
}
   0xc   :  { %20 = dma.hbm_to_vmem [thread:$0]  %s677_s0, 128, %s18_s13, [#allocation3]  }
   0xd   :  { %s540_s19 = scalar_lea.vmem %s27_s15, 6144  ;;  %p545_p6 = scmp.lt.s32.totalorder %s27_s15, %s27_s15 }
   0xe   :  { %p541_p5 = scmp.ne.s32.totalorder %s27_s15, %s540_s19  ;;  %p546_p7 = scmp.lt.s32.totalorder %s540_s19, %s540_s19 }
  0x10   :  { %p547_p8 = por %p546_p7, %p545_p6 }
  0x12   :  { %p548_p9 = pnand %p547_p8, %p541_p5 }
  0x14   :  { %551 = shalt.err (!%p548_p9)
}
  0x15   :  { %s580_s20 = smov 128   ;;  %s581_s21 = smov 8  }
  0x16   :  { %32 = dma.hbm_to_vmem [thread:$0]  %s678_s1, 6144, %s27_s15, [#allocation6], %s580_s20, %s580_s20, %s581_s21  }
  0x17   :  { %572 = dma.done.wait [#allocation3], 128  }
  0x18   :  { %573 = vsyncadd [#allocation3], 4294967168 }
  0x19   :  { %574 = dma.done.wait [#allocation6], 6144  }
  0x1a   :  { %575 = vsyncadd [#allocation6], 4294961152  ;;  %v582_v0 = vmov 0.0   ;;  %vm583_vm0 = vmmov 0   ;;  %v57_v1 = vld [vmem:[#allocation5 + $0x78] sm:$0xff]  ;;  %v56_v2 = vld [vmem:[#allocation5 + $0x70] sm:$0xff] }
  0x1b   :  { %400 = vmatprep.subr.mxu0 %v582_v0  ;;  %432 = vmatprep.mubr.msk.f32.mxu0 %vm583_vm0, %v582_v0  ;;  %v55_v3 = vld [vmem:[#allocation5 + $0x68] sm:$0xff]  ;;  %v54_v4 = vld [vmem:[#allocation5 + $0x60] sm:$0xff]  ;;  %v152_v5 = vld [vmem:[#allocation5 + $0xf8] sm:$0xff]  ;;  %s584_s28 = smov [#allocation7]  }
  0x1c   :  { %435 = vmatprep.subr.mxu1 %v582_v0  ;;  %467 = vmatprep.mubr.msk.f32.mxu1 %vm583_vm0, %v582_v0  ;;  %v53_v6 = vld [vmem:[#allocation5 + $0x58] sm:$0xff]  ;;  %v151_v7 = vld [vmem:[#allocation5 + $0xf0] sm:$0xff]  ;;  %v150_v8 = vld [vmem:[#allocation5 + $0xe8] sm:$0xff]  ;;  %s334_s29 = sshll.u32 %s584_s28, 4  ;;  %s335_s29 = int_to_ptr.vmem [resolvable:$true] %s334_s29 }
  0x1d   :  { %401 = vmatpush3.msra.mxu0 %v57_v1  ;;  %436 = vmatpush3.msra.mxu1 %v152_v5  ;;  %v52_v9 = vld [vmem:[#allocation5 + $0x50] sm:$0xff]  ;;  %v149_v10 = vld [vmem:[#allocation5 + $0xe0] sm:$0xff]  ;;  %v51_v11 = vld [vmem:[#allocation5 + $0x48] sm:$0xff]  ;;  %s552_s30 = scalar_lea.vmem %s335_s29, 128  ;;  %p557_p11 = scmp.lt.s32.totalorder %s335_s29, %s335_s29 }
  0x1e   :  { %402 = vmatprep.subr.mxu0 %v582_v0  ;;  %437 = vmatprep.subr.mxu1 %v582_v0  ;;  %v148_v12 = vld [vmem:[#allocation5 + $0xd8] sm:$0xff]  ;;  %v50_v13 = vld [vmem:[#allocation5 + $0x40] sm:$0xff]  ;;  %v147_v14 = vld [vmem:[#allocation5 + $0xd0] sm:$0xff]  ;;  %p553_p10 = scmp.ne.s32.totalorder %s335_s29, %s552_s30  ;;  %p558_p12 = scmp.lt.s32.totalorder %s552_s30, %s552_s30 }
  0x1f   :  { %403 = vmatpush3.msra.mxu0 %v56_v2  ;;  %438 = vmatpush3.msra.mxu1 %v151_v7  ;;  %v49_v15 = vld [vmem:[#allocation5 + $0x38] sm:$0xff]  ;;  %v146_v16 = vld [vmem:[#allocation5 + $0xc8] sm:$0xff]  ;;  %v48_v17 = vld [vmem:[#allocation5 + $0x30] sm:$0xff] }
  0x20   :  { %404 = vmatprep.subr.mxu0 %v582_v0  ;;  %439 = vmatprep.subr.mxu1 %v582_v0  ;;  %v145_v18 = vld [vmem:[#allocation5 + $0xc0] sm:$0xff]  ;;  %v47_v19 = vld [vmem:[#allocation5 + $0x28] sm:$0xff]  ;;  %v144_v20 = vld [vmem:[#allocation5 + $0xb8] sm:$0xff]  ;;  %p559_p13 = por %p558_p12, %p557_p11 }
  0x21   :  { %405 = vmatpush3.msra.mxu0 %v55_v3  ;;  %440 = vmatpush3.msra.mxu1 %v150_v8  ;;  %v46_v21 = vld [vmem:[#allocation5 + $0x20] sm:$0xff]  ;;  %v143_v22 = vld [vmem:[#allocation5 + $0xb0] sm:$0xff]  ;;  %v45_v23 = vld [vmem:[#allocation5 + $0x18] sm:$0xff] }
  0x22   :  { %406 = vmatprep.subr.mxu0 %v582_v0  ;;  %441 = vmatprep.subr.mxu1 %v582_v0  ;;  %v142_v24 = vld [vmem:[#allocation5 + $0xa8] sm:$0xff]  ;;  %v44_v25 = vld [vmem:[#allocation5 + $0x10] sm:$0xff]  ;;  %v141_v26 = vld [vmem:[#allocation5 + $0xa0] sm:$0xff]  ;;  %p560_p0 = pnand %p559_p13, %p553_p10 }
  0x23   :  { %407 = vmatpush3.msra.mxu0 %v54_v4  ;;  %442 = vmatpush3.msra.mxu1 %v149_v10  ;;  %v43_v27 = vld [vmem:[#allocation5 + $0x8] sm:$0xff]  ;;  %v140_v28 = vld [vmem:[#allocation5 + $0x98] sm:$0xff]  ;;  %v42_v29 = vld [vmem:[#allocation5] sm:$0xff] }
  0x24   :  { %408 = vmatprep.subr.mxu0 %v582_v0  ;;  %443 = vmatprep.subr.mxu1 %v582_v0  ;;  %v41_v30 = vld [vmem:[#allocation2] sm:$0xff]  ;;  %v139_v31 = vld [vmem:[#allocation5 + $0x90] sm:$0xff]  ;;  %v138_v32 = vld [vmem:[#allocation5 + $0x88] sm:$0xff] }
  0x25   :  { %409 = vmatpush3.msra.mxu0 %v53_v6  ;;  %444 = vmatpush3.msra.mxu1 %v148_v12  ;;  %v137_v33 = vld [vmem:[#allocation5 + $0x80] sm:$0xff]  ;;  %v248_v34 = vld [vmem:[#allocation5 + $0x178] sm:$0xff]  ;;  %v247_v35 = vld [vmem:[#allocation5 + $0x170] sm:$0xff] }
  0x26   :  { %410 = vmatprep.subr.mxu0 %v582_v0  ;;  %445 = vmatprep.subr.mxu1 %v582_v0  ;;  %v246_v36 = vld [vmem:[#allocation5 + $0x168] sm:$0xff]  ;;  %v245_v37 = vld [vmem:[#allocation5 + $0x160] sm:$0xff]  ;;  %v244_v38 = vld [vmem:[#allocation5 + $0x158] sm:$0xff] }
  0x27   :  { %411 = vmatpush3.msra.mxu0 %v52_v9  ;;  %446 = vmatpush3.msra.mxu1 %v147_v14  ;;  %v243_v39 = vld [vmem:[#allocation5 + $0x150] sm:$0xff]  ;;  %v242_v40 = vld [vmem:[#allocation5 + $0x148] sm:$0xff]  ;;  %v241_v41 = vld [vmem:[#allocation5 + $0x140] sm:$0xff] }
  0x28   :  { %412 = vmatprep.subr.mxu0 %v582_v0  ;;  %447 = vmatprep.subr.mxu1 %v582_v0  ;;  %v240_v42 = vld [vmem:[#allocation5 + $0x138] sm:$0xff]  ;;  %v239_v43 = vld [vmem:[#allocation5 + $0x130] sm:$0xff]  ;;  %v238_v44 = vld [vmem:[#allocation5 + $0x128] sm:$0xff] }
  0x29   :  { %413 = vmatpush3.msra.mxu0 %v51_v11  ;;  %448 = vmatpush3.msra.mxu1 %v146_v16  ;;  %v237_v45 = vld [vmem:[#allocation5 + $0x120] sm:$0xff]  ;;  %v236_v46 = vld [vmem:[#allocation5 + $0x118] sm:$0xff]  ;;  %v235_v52 = vld [vmem:[#allocation5 + $0x110] sm:$0xff] }
  0x2a   :  { %414 = vmatprep.subr.mxu0 %v582_v0  ;;  %449 = vmatprep.subr.mxu1 %v582_v0  ;;  %v344_v47 = vld [vmem:[%s679_s2] ss:$0 sm:$0xff]  ;;  %v234_v53 = vld [vmem:[#allocation5 + $0x108] sm:$0xff]  ;;  %v233_v54 = vld [vmem:[#allocation5 + $0x100] sm:$0xff] }
  0x2b   :  { %415 = vmatpush3.msra.mxu0 %v50_v13  ;;  %450 = vmatpush3.msra.mxu1 %v145_v18  ;;  %v346_v55 = vld [vmem:[%s679_s2 + $0x1] ss:$0 sm:$0xff]  ;;  %v348_v60 = vld [vmem:[%s679_s2 + $0x2] ss:$0 sm:$0xff] }
  0x2c   :  { %416 = vmatprep.subr.mxu0 %v582_v0  ;;  %451 = vmatprep.subr.mxu1 %v582_v0 }
  0x2d   :  { %417 = vmatpush3.msra.mxu0 %v49_v15  ;;  %452 = vmatpush3.msra.mxu1 %v144_v20 }
  0x2e   :  { %418 = vmatprep.subr.mxu0 %v582_v0  ;;  %453 = vmatprep.subr.mxu1 %v582_v0 }
  0x2f   :  { %419 = vmatpush3.msra.mxu0 %v48_v17  ;;  %454 = vmatpush3.msra.mxu1 %v143_v22 }
  0x30   :  { %420 = vmatprep.subr.mxu0 %v582_v0  ;;  %455 = vmatprep.subr.mxu1 %v582_v0 }
  0x31   :  { %421 = vmatpush3.msra.mxu0 %v47_v19  ;;  %456 = vmatpush3.msra.mxu1 %v142_v24 }
  0x32   :  { %422 = vmatprep.subr.mxu0 %v582_v0  ;;  %457 = vmatprep.subr.mxu1 %v582_v0 }
  0x33   :  { %423 = vmatpush3.msra.mxu0 %v46_v21  ;;  %458 = vmatpush3.msra.mxu1 %v141_v26 }
  0x34   :  { %424 = vmatprep.subr.mxu0 %v582_v0  ;;  %459 = vmatprep.subr.mxu1 %v582_v0 }
  0x35   :  { %425 = vmatpush3.msra.mxu0 %v45_v23  ;;  %460 = vmatpush3.msra.mxu1 %v140_v28 }
  0x36   :  { %426 = vmatprep.subr.mxu0 %v582_v0  ;;  %461 = vmatprep.subr.mxu1 %v582_v0 }
  0x37   :  { %427 = vmatpush3.msra.mxu0 %v44_v25  ;;  %462 = vmatpush3.msra.mxu1 %v139_v31 }
  0x38   :  { %428 = vmatprep.subr.mxu0 %v582_v0  ;;  %463 = vmatprep.subr.mxu1 %v582_v0 }
  0x39   :  { %429 = vmatpush3.msra.mxu0 %v43_v27  ;;  %464 = vmatpush3.msra.mxu1 %v138_v32 }
  0x3a   :  { %430 = vmatprep.subr.mxu0 %v582_v0  ;;  %465 = vmatprep.subr.mxu1 %v582_v0 }
  0x3b   :  { %431 = vmatpush3.msra.mxu0 %v42_v29  ;;  %466 = vmatpush3.msra.mxu1 %v137_v33 }
  0x3c   :  { %433 = vmatmul.mubr.f32.vlgmr.msra.gmra.mxu0 %v41_v30  ;;  %470 = vmatprep.subr.mxu0 %v582_v0 }
  0x3d   :  { %502 = vmatprep.mubr.msk.f32.mxu0 %vm583_vm0, %v582_v0  ;;  %471 = vmatpush3.msra.mxu0 %v248_v34 }
  0x3e   :  { %472 = vmatprep.subr.mxu0 %v582_v0 }
  0x3f   :  { %473 = vmatpush3.msra.mxu0 %v247_v35 }
  0x40   :  { %474 = vmatprep.subr.mxu0 %v582_v0 }
  0x41   :  { %475 = vmatpush3.msra.mxu0 %v246_v36 }
  0x42   :  { %476 = vmatprep.subr.mxu0 %v582_v0 }
  0x43   :  { %477 = vmatpush3.msra.mxu0 %v245_v37 }
  0x44   :  { %478 = vmatprep.subr.mxu0 %v582_v0 }
  0x45   :  { %479 = vmatpush3.msra.mxu0 %v244_v38 }
  0x46   :  { %480 = vmatprep.subr.mxu0 %v582_v0 }
  0x47   :  { %481 = vmatpush3.msra.mxu0 %v243_v39 }
  0x48   :  { %482 = vmatprep.subr.mxu0 %v582_v0 }
  0x49   :  { %483 = vmatpush3.msra.mxu0 %v242_v40 }
  0x4a   :  { %484 = vmatprep.subr.mxu0 %v582_v0 }
  0x4b   :  { %485 = vmatpush3.msra.mxu0 %v241_v41 }
  0x4c   :  { %486 = vmatprep.subr.mxu0 %v582_v0 }
  0x4d   :  { %487 = vmatpush3.msra.mxu0 %v240_v42 }
  0x4e   :  { %488 = vmatprep.subr.mxu0 %v582_v0 }
  0x4f   :  { %489 = vmatpush3.msra.mxu0 %v239_v43 }
  0x50   :  { %490 = vmatprep.subr.mxu0 %v582_v0 }
  0x51   :  { %491 = vmatpush3.msra.mxu0 %v238_v44 }
  0x52   :  { %492 = vmatprep.subr.mxu0 %v582_v0 }
  0x53   :  { %493 = vmatpush3.msra.mxu0 %v237_v45 }
  0x54   :  { %494 = vmatprep.subr.mxu0 %v582_v0 }
  0x55   :  { %495 = vmatpush3.msra.mxu0 %v236_v46 }
  0x56   :  { %496 = vmatprep.subr.mxu0 %v582_v0 }
  0x57   :  { %497 = vmatpush3.msra.mxu0 %v235_v52 }
  0x58   :  { %498 = vmatprep.subr.mxu0 %v582_v0 }
  0x59   :  { %499 = vmatpush3.msra.mxu0 %v234_v53 }
  0x5a   :  { %500 = vmatprep.subr.mxu0 %v582_v0 }
  0x5b   :  { %501 = vmatpush3.msra.mxu0 %v233_v54 }
  0xfc   :  { %v131_v48 = vpop.f32.mrf.mxu0 }
  0xfd   :  { %v132_v49 = vadd.f32 %v344_v47, %v131_v48 }
  0xfe   :  { %v434_v50 = vpop.f32.mrf.mxu0 }
  0xff   :  { %v135_v51 = vmax.f32 %v132_v49, 0.0 }
 0x101   :  { %468 = vmatmul.mubr.f32.vlgmr.msra.gmra.mxu1 %v135_v51 }
 0x1c1   :  { %v227_v56 = vpop.f32.mrf.mxu1 }
 0x1c2   :  { %v228_v57 = vadd.f32 %v346_v55, %v227_v56 }
 0x1c3   :  { %v469_v58 = vpop.f32.mrf.mxu1 }
 0x1c4   :  { %v231_v59 = vmax.f32 %v228_v57, 0.0 }
 0x1c6   :  { %503 = vmatmul.mubr.f32.vlgmr.msra.gmra.mxu0 %v231_v59 }
 0x286   :  { %v323_v61 = vpop.f32.mrf.mxu0 }
 0x287   :  { %v324_v62 = vadd.f32 %v348_v60, %v323_v61 }
 0x288   :  { %v504_v63 = vpop.f32.mrf.mxu0 }
 0x289   :  { %327 = vst [vmem:[#allocation7] sm:$0xff] %v324_v62 }
 0x28a   :  { %563 = shalt.err (!%p560_p0)
}
 0x28b   :  { %337 = dma.vmem_to_hbm [thread:$0]  %s335_s29, 128, %s680_s3, [#allocation4]  }
 0x28c   :  { %576 = dma.done.wait [#allocation4], 128  }
 0x28d   :  { %577 = vsyncadd [#allocation4], 4294967168 }
 0x28e   :  { %341 = vsyncpa [#allocation3], 1 }
 0x28f   :  { %342 = vsyncpa [#allocation6], 1 }
 0x290   :  { %343 = vsyncpa [#allocation4], 1 }

</bundles_post_ra>
